<compile_context>
chip_gen: v7x
topology: tpu7x:2x2x1
jax: 0.10.0
libtpu: 0.0.40
codegen_flags: <defaults>
</compile_context>

<pallas_src>
import functools

import jax
import jax.numpy as jnp
from jax.experimental import pallas as pl
from jax.experimental.pallas import tpu as pltpu

_EPS = 1e-6        # matches torch.nn.functional.pairwise_distance default eps
_OUT_LANES = 128   # lane-dense partial-sum output
_OUT_SUB = 8       # sublane-aligned output block (8, 128)


def _round_up(x, m):
    return ((x + m - 1) // m) * m


def _vmem_capacity_bytes():
    """Physical VMEM per core; conservative 64 MiB (v7x) fallback."""
    try:
        info = pltpu.get_tpu_info()
        cap = getattr(info, "vmem_capacity_bytes", None)
        if cap:
            return int(cap)
    except Exception:
        pass
    return 64 * 1024 * 1024


def _tile_plan(B, D, itemsize):
    """Pick (TB, TD, vmem_limit_bytes) from a generation-aware VMEM budget."""
    cap = _vmem_capacity_bytes()
    # Pipelined-footprint target: ~cap/4 (=> 16 MiB on 64 MiB v7x, 32 MiB on
    # 128 MiB v5e/v6e).  Compiler scoped-VMEM limit raised accordingly.
    budget = min(cap // 4, 32 * 1024 * 1024)
    vmem_limit = int(min((cap * 3) // 4, 96 * 1024 * 1024))

    sub = max(8, 32 // itemsize)          # sublane multiple: 8 f32 / 16 bf16 / 32 int8

    lbl_bytes_per_row = 2 * 128 * 4       # double-buffered (TB,1) label, lane-padded f32
    acc_bytes_per_row = 128 * 4           # (TB,1) f32 accumulator scratch (single buffer)

    def per_row_bytes(td):
        tdp = _round_up(td, 128)          # lane-padded feature width in VMEM
        return 2 * 2 * tdp * itemsize + lbl_bytes_per_row + acc_bytes_per_row

    if sub * per_row_bytes(D) <= budget:
        # Row tiling only: stream full-width (TB, D) tiles, biggest TB that fits.
        td = D
        tb = min(B, budget // per_row_bytes(D))
        if tb < B:
            tb = max(sub, (tb // sub) * sub)
    else:
        # Huge D: fix TB at the sublane multiple and tile D (128-aligned tiles).
        tb = min(B, sub)
        fixed = tb * (lbl_bytes_per_row + acc_bytes_per_row)
        max_cols = max(128, (budget - fixed) // (4 * tb * itemsize))
        td = min(D, max(128, (max_cols // 128) * 128))

    # v7x megacore: make sure the "parallel" batch axis has >= 2 tiles to shard
    # across both TensorCores whenever the batch is large enough to split.
    if tb >= B and B >= 2 * sub:
        tb = max(sub, _round_up((B + 1) // 2, sub))

    return tb, td, vmem_limit


def _contrastive_kernel(x1_ref, x2_ref, lbl_ref, out_ref, acc_ref, *,
                        total_rows, total_cols, ragged_rows, ragged_cols):
    """Grid (row_tile i, d_tile j): accumulate per-row ||diff||^2 across j,
    finalize (sqrt, -label, square, mask, sum) on the last j step."""
    i = pl.program_id(0)
    j = pl.program_id(1)
    nd = pl.num_programs(1)
    tb, td = x1_ref.shape

    # Elementwise diff (VPU) in fp32; eps added per element (torch semantics).
    diff = x1_ref[...].astype(jnp.float32) - x2_ref[...].astype(jnp.float32) + _EPS
    if ragged_cols:  # static: only emitted when D % TD != 0
        col_ids = j * td + jax.lax.broadcasted_iota(jnp.int32, (tb, td), 1)
        diff = jnp.where(col_ids < total_cols, diff, 0.0)
    part_sq = jnp.sum(diff * diff, axis=-1, keepdims=True)          # (TB, 1)

    @pl.when(j == 0)
    def _():
        acc_ref[...] = jnp.zeros_like(acc_ref)

    acc_ref[...] += part_sq

    @pl.when(j == nd - 1)
    def _():
        dist = jnp.sqrt(acc_ref[...])                                # (TB, 1)
        err = dist - lbl_ref[...].astype(jnp.float32)
        sq_err = err * err
        if ragged_rows:  # static: only emitted when B % TB != 0 (select drops garbage)
            row_ids = i * tb + jax.lax.broadcasted_iota(jnp.int32, (tb, 1), 0)
            sq_err = jnp.where(row_ids < total_rows, sq_err, 0.0)
        partial = jnp.sum(sq_err)
        # Lane-dense, fully (8,128)-aligned broadcast store of the tile partial.
        out_ref[...] = jnp.full(out_ref.shape, partial, dtype=out_ref.dtype)


def contrastive_loss2(output1, output2, label):
    """Pallas implementation of ContrastiveLoss2.forward. Returns a scalar."""
    B, D = output1.shape
    label2d = label.reshape(B, 1)
    itemsize = jnp.dtype(output1.dtype).itemsize

    TB, TD, vmem_limit = _tile_plan(B, D, itemsize)
    num_row_tiles = pl.cdiv(B, TB)
    num_d_tiles = pl.cdiv(D, TD)

    kernel = functools.partial(
        _contrastive_kernel,
        total_rows=B,
        total_cols=D,
        ragged_rows=(B % TB != 0),
        ragged_cols=(D % TD != 0),
    )

    partials = pl.pallas_call(
        kernel,
        out_shape=jax.ShapeDtypeStruct((num_row_tiles * _OUT_SUB, _OUT_LANES),
                                       jnp.float32),
        grid=(num_row_tiles, num_d_tiles),
        in_specs=[
            pl.BlockSpec((TB, TD), lambda i, j: (i, j)),
            pl.BlockSpec((TB, TD), lambda i, j: (i, j)),
            pl.BlockSpec((TB, 1), lambda i, j: (i, 0)),
        ],
        out_specs=pl.BlockSpec((_OUT_SUB, _OUT_LANES), lambda i, j: (i, 0)),
        scratch_shapes=[pltpu.VMEM((TB, 1), jnp.float32)],
        compiler_params=pltpu.CompilerParams(
            dimension_semantics=("parallel", "arbitrary"),
            vmem_limit_bytes=vmem_limit,
        ),
        cost_estimate=pl.CostEstimate(
            flops=5 * B * D + 4 * B,
            transcendentals=B,
            bytes_accessed=(2 * B * D * itemsize + 4 * B
                            + 4 * num_row_tiles * _OUT_SUB * _OUT_LANES),
        ),
    )(output1, output2, label2d)

    # O(num_tiles) finalize: one partial per tile (row i*8), scale by 1/B.
    return partials[::_OUT_SUB, 0].sum() * (1.0 / B)


def _reference(output1, output2, label):
    diff = output1.astype(jnp.float32) - output2.astype(jnp.float32) + _EPS
    d = jnp.sqrt(jnp.sum(diff * diff, axis=-1))
    return jnp.mean((d - label.astype(jnp.float32)) ** 2)


if __name__ == "__main__":
    key = jax.random.PRNGKey(0)
    k1, k2, k3 = jax.random.split(key, 3)

    B, D = 8, 32
    output1 = jax.random.normal(k1, (B, D), dtype=jnp.float32)
    output2 = jax.random.normal(k2, (B, D), dtype=jnp.float32)
    # Labels in {0, 1} like a typical contrastive setup.
    label = jax.random.bernoulli(k3, 0.5, (B,)).astype(jnp.float32)

    loss = contrastive_loss2(output1, output2, label)
    loss = jax.block_until_ready(loss)

    ref = jax.block_until_ready(_reference(output1, output2, label))
    assert jnp.allclose(loss, ref, rtol=1e-5, atol=1e-5), (loss, ref)

    print("KERNEL_OK")
</pallas_src>

<mosaic_0001>
module attributes {stable_mosaic.version = 11 : i64} {
  func.func @_contrastive_kernel(%arg0: i32, %arg1: i32, %arg2: memref<8x32xf32, #tpu.memory_space<vmem>>, %arg3: memref<8x32xf32, #tpu.memory_space<vmem>>, %arg4: memref<8x1xf32, #tpu.memory_space<vmem>>, %arg5: memref<8x128xf32, #tpu.memory_space<vmem>>, %arg6: memref<8x1xf32, #tpu.memory_space<vmem>>) attributes {dimension_semantics = [#tpu.dimension_semantics<parallel>, #tpu.dimension_semantics<arbitrary>], iteration_bounds = array<i64: 1, 1>, scalar_prefetch = 0 : i64, scratch_operands = 1 : i64, tpu.core_type = #tpu.core_type<tc>, window_params = [{transform_indices = @transform_0, window_bounds = array<i64: 8, 32>}, {transform_indices = @transform_1, window_bounds = array<i64: 8, 32>}, {transform_indices = @transform_2, window_bounds = array<i64: 8, 1>}, {transform_indices = @transform_3, window_bounds = array<i64: 8, 128>}]} {
    %c0 = arith.constant 0 : index
    %c0_0 = arith.constant 0 : index
    %0 = vector.load %arg2[%c0, %c0_0] : memref<8x32xf32, #tpu.memory_space<vmem>>, vector<8x32xf32>
    %c0_1 = arith.constant 0 : index
    %c0_2 = arith.constant 0 : index
    %1 = vector.load %arg3[%c0_1, %c0_2] : memref<8x32xf32, #tpu.memory_space<vmem>>, vector<8x32xf32>
    %2 = arith.subf %0, %1 : vector<8x32xf32>
    %cst = arith.constant 9.99999997E-7 : f32
    %3 = vector.broadcast %cst : f32 to vector<8x32xf32>
    %4 = arith.addf %2, %3 : vector<8x32xf32>
    %5 = arith.mulf %4, %4 : vector<8x32xf32>
    %cst_3 = arith.constant dense<0.000000e+00> : vector<8xf32>
    %6 = vector.multi_reduction <add>, %5, %cst_3 [1] : vector<8x32xf32> to vector<8xf32>
    %7 = vector.shape_cast %6 : vector<8xf32> to vector<8x1xf32>
    %c0_i32 = arith.constant 0 : i32
    %8 = arith.cmpi eq, %arg1, %c0_i32 : i32
    %9 = arith.extui %8 : i1 to i32
    %c0_i32_4 = arith.constant 0 : i32
    %10 = arith.cmpi ne, %9, %c0_i32_4 : i32
    scf.if %10 {
      %cst_11 = arith.constant 0.000000e+00 : f32
      %17 = vector.broadcast %cst_11 : f32 to vector<8x1xf32>
      %c0_12 = arith.constant 0 : index
      %c0_13 = arith.constant 0 : index
      %18 = vector.load %arg6[%c0_12, %c0_13] : memref<8x1xf32, #tpu.memory_space<vmem>>, vector<8x1xf32>
      tpu.vector_store %arg6[%c0_12, %c0_13], %17 {strides = array<i32>} : memref<8x1xf32, #tpu.memory_space<vmem>>, vector<8x1xf32>,
    } else {
    }
    %c0_5 = arith.constant 0 : index
    %c0_6 = arith.constant 0 : index
    %11 = vector.load %arg6[%c0_5, %c0_6] : memref<8x1xf32, #tpu.memory_space<vmem>>, vector<8x1xf32>
    %12 = arith.addf %11, %7 : vector<8x1xf32>
    %c0_7 = arith.constant 0 : index
    %c0_8 = arith.constant 0 : index
    %13 = vector.load %arg6[%c0_7, %c0_8] : memref<8x1xf32, #tpu.memory_space<vmem>>, vector<8x1xf32>
    tpu.vector_store %arg6[%c0_7, %c0_8], %12 {strides = array<i32>} : memref<8x1xf32, #tpu.memory_space<vmem>>, vector<8x1xf32>,
    %c0_i32_9 = arith.constant 0 : i32
    %14 = arith.cmpi eq, %arg1, %c0_i32_9 : i32
    %15 = arith.extui %14 : i1 to i32
    %c0_i32_10 = arith.constant 0 : i32
    %16 = arith.cmpi ne, %15, %c0_i32_10 : i32
    scf.if %16 {
      %c0_11 = arith.constant 0 : index
      %c0_12 = arith.constant 0 : index
      %17 = vector.load %arg6[%c0_11, %c0_12] : memref<8x1xf32, #tpu.memory_space<vmem>>, vector<8x1xf32>
      %18 = math.sqrt %17 : vector<8x1xf32>
      %c0_13 = arith.constant 0 : index
      %c0_14 = arith.constant 0 : index
      %19 = vector.load %arg4[%c0_13, %c0_14] : memref<8x1xf32, #tpu.memory_space<vmem>>, vector<8x1xf32>
      %20 = arith.subf %18, %19 : vector<8x1xf32>
      %21 = arith.mulf %20, %20 : vector<8x1xf32>
      %22 = vector.shape_cast %21 : vector<8x1xf32> to vector<1x8x1xf32>
      %cst_15 = arith.constant dense<0.000000e+00> : vector<1xf32>
      %23 = vector.multi_reduction <add>, %22, %cst_15 [1, 2] : vector<1x8x1xf32> to vector<1xf32>
      %24 = vector.shape_cast %23 : vector<1xf32> to vector<1x1x1xf32>
      %25 = vector.extract %24[0, 0, 0] : f32 from vector<1x1x1xf32>
      %26 = vector.broadcast %25 : f32 to vector<8x128xf32>
      %c0_16 = arith.constant 0 : index
      %c0_17 = arith.constant 0 : index
      %27 = vector.load %arg5[%c0_16, %c0_17] : memref<8x128xf32, #tpu.memory_space<vmem>>, vector<8x128xf32>
      tpu.vector_store %arg5[%c0_16, %c0_17], %26 {strides = array<i32>} : memref<8x128xf32, #tpu.memory_space<vmem>>, vector<8x128xf32>,
    } else {
    }
    return
  }
  func.func @transform_0(%arg0: i32, %arg1: i32) -> (i32, i32) {
    %c0_i32 = arith.constant 0 : i32
    return %arg0, %arg1 : i32, i32
  }
  func.func @transform_1(%arg0: i32, %arg1: i32) -> (i32, i32) {
    %c0_i32 = arith.constant 0 : i32
    return %arg0, %arg1 : i32, i32
  }
  func.func @transform_2(%arg0: i32, %arg1: i32) -> (i32, i32) {
    %c0_i32 = arith.constant 0 : i32
    %c0_i32_0 = arith.constant 0 : i32
    return %arg0, %c0_i32 : i32, i32
  }
  func.func @transform_3(%arg0: i32, %arg1: i32) -> (i32, i32) {
    %c0_i32 = arith.constant 0 : i32
    %c0_i32_0 = arith.constant 0 : i32
    return %arg0, %c0_i32 : i32, i32
  }
}

</mosaic_0001>

<bundles_post_ra>
// kernel: tpu_custom_call.1
= control target key start
LH: loop header
LB: loop body
LE: loop exit
PB: predicated region body
PF: predicated region fallthrough
CT: control target
= control target key end

     0   :  { %8 = vsyncpa [#allocation4], 0  ;;  %s198_s0 = inlined_call_operand.vmem [shape: f32[8,32], index: 0, kind: input, shape index: {}]   ;;  %s199_s1 = inlined_call_operand.hbm [shape: f32[8,32], index: 1, kind: input, shape index: {}]   ;;  %s200_s2 = inlined_call_operand.vmem [shape: f32[8,1], index: 2, kind: input, shape index: {}]   ;;  %s201_s3 = inlined_call_operand.hbm [shape: f32[8,128], index: 3, kind: output, shape index: {}]  }
   0x1   :  { %9 = vsyncpa [#allocation5], 0  ;;  %s142_s12 = smov [#allocation3]   ;;  %s94_s16 = scalar_lea.hbm %s199_s1, 128 }
   0x2   :  { %s18_s13 = sshll.u32 %s142_s12, 4  ;;  %p95_p0 = scmp.ne.s32.totalorder %s199_s1, %s94_s16  ;;  %s19_s13 = int_to_ptr.vmem [resolvable:$true] %s18_s13 }
   0x3   :  { %p98_p1 = scmp.lt.u32.totalorder %s94_s16, %s199_s1 }
   0x5   :  { %p100_p2 = pnand %p98_p1, %p95_p0 }
   0x7   :  { %103 = shalt.err (!%p100_p2)
}
   0x8   :  { %s104_s21 = scalar_lea.vmem %s19_s13, 128  ;;  %p109_p4 = scmp.lt.s32.totalorder %s19_s13, %s19_s13 }
   0x9   :  { %p105_p3 = scmp.ne.s32.totalorder %s19_s13, %s104_s21  ;;  %p110_p5 = scmp.lt.s32.totalorder %s104_s21, %s104_s21 }
   0xb   :  { %p111_p6 = por %p110_p5, %p109_p4 }
   0xd   :  { %p112_p7 = pnand %p111_p6, %p105_p3 }
   0xf   :  { %115 = shalt.err (!%p112_p7)
}
  0x10   :  { %21 = dma.hbm_to_vmem [thread:$0]  %s199_s1, 128, %s19_s13, [#allocation4]  }
  0x11   :  { %138 = dma.done.wait [#allocation4], 128  }
  0x12   :  { %139 = vsyncadd [#allocation4], 4294967168  ;;  %vm40_vm0 = vcmask 7168   ;;  %v143_v0 = vmov 0.0   ;;  %v27_v1 = vld [vmem:[%s198_s0] sm:$0xff]  ;;  %v28_v2 = vld [vmem:[#allocation3] sm:$0xff] }
  0x13   :  { %41 = vst.msk [vmem:[#allocation2] sm:$0xff] %vm40_vm0, %v143_v0  ;;  %v29_v3 = vsub.f32 %v27_v1, %v28_v2  ;;  %vm32_vm1 = vcmask 261120   ;;  %v57_v14 = vld [vmem:[%s200_s2] sm:$0xff]  ;;  %s144_s26 = smov [#allocation6]  }
  0x14   :  { %s78_s27 = sshll.u32 %s144_s26, 4  ;;  %s79_s27 = int_to_ptr.vmem [resolvable:$true] %s78_s27 }
  0x15   :  { %v30_v4 = vadd.f32 1e-06, %v29_v3  ;;  %s116_s2 = scalar_lea.vmem %s79_s27, 128  ;;  %p121_p9 = scmp.lt.s32.totalorder %s79_s27, %s79_s27 }
  0x16   :  { %p117_p8 = scmp.ne.s32.totalorder %s79_s27, %s116_s2  ;;  %p122_p10 = scmp.lt.s32.totalorder %s116_s2, %s116_s2 }
  0x17   :  { %v31_v5 = vmul.f32 %v30_v4, %v30_v4 }
  0x18   :  { %p123_p11 = por %p122_p10, %p121_p9 }
  0x19   :  { %v33_v6 = vsel %vm32_vm1, %v31_v5, 0.0 }
  0x1a   :  { %34 = vadd.xlane.f32.xlu0 %v33_v6  ;;  %v42_v7 = vld [vmem:[#allocation2] sm:$0xff]  ;;  %p124_p12 = pnand %p123_p11, %p117_p8 }
  0xa7   :  { %v35_v8 = vpop.xlane.xlu0 %34 }
  0xa8   :  { %v43_v9 = vadd.f32 %v42_v7, %v35_v8 }
  0xaa   :  { %45 = vst.msk [vmem:[#allocation2] sm:$0xff] %vm40_vm0, %v43_v9 }
  0xb1   :  { %v49_v10 = vld [vmem:[#allocation2] sm:$0xff] }
  0xb2   :  { %92 = vrsqrt.f32 %v49_v10  ;;  %vm52_vm2 = vcmp.eq.f32.partialorder %v49_v10, inf  ;;  %v55_v13 = vand.u32 2147483648, %v49_v10  ;;  %vm54_vm3 = vcmp.eq.f32.partialorder %v49_v10, 0.0 }
  0xbc   :  { %v93_v11 = vpop.eup %92 }
  0xbd   :  { %v51_v12 = vmul.f32 %v93_v11, %v49_v10 }
  0xbf   :  { %v53_v15 = vsel %vm52_vm2, %v49_v10, %v51_v12 }
  0xc0   :  { %v56_v16 = vsel %vm54_vm3, %v55_v13, %v53_v15 }
  0xc1   :  { %v58_v17 = vsub.f32 %v56_v16, %v57_v14 }
  0xc3   :  { %v59_v18 = vmul.f32 %v58_v17, %v58_v17 }
  0xc5   :  { %v60_v19 = vsel %vm40_vm0, %v59_v18, 0.0 }
  0xc6   :  { %61 = vadd.xlane.f32.xlu0 %v60_v19 }
 0x153   :  { %v62_v20 = vpop.xlane.xlu0 %61 }
 0x154   :  { %v63_v21 = vrot.slane %v62_v20, 4 }
 0x156   :  { %v64_v22 = vadd.f32 %v63_v21, %v62_v20 }
 0x158   :  { %v65_v23 = vrot.slane %v64_v22, 2 }
 0x15a   :  { %v66_v24 = vadd.f32 %v65_v23, %v64_v22 }
 0x15c   :  { %v67_v25 = vrot.slane %v66_v24, 1 }
 0x15e   :  { %v68_v26 = vadd.f32 %v67_v25, %v66_v24 }
 0x160   :  { %87 = vpush %v68_v26 }
 0x191   :  { %s88_s28 = spop %87 }
 0x192   :  { %v70_v27 = vstv %s88_s28 }
 0x193   :  { %71 = vst [vmem:[#allocation6] sm:$0xff] %v70_v27 }
 0x194   :  { %127 = shalt.err (!%p124_p12)
}
 0x195   :  { %s128_s4 = scalar_lea.hbm %s201_s3, 128 }
 0x196   :  { %p129_p13 = scmp.ne.s32.totalorder %s201_s3, %s128_s4  ;;  %p132_p0 = scmp.lt.u32.totalorder %s128_s4, %s201_s3 }
 0x198   :  { %p134_p1 = pnand %p132_p0, %p129_p13 }
 0x19a   :  { %137 = shalt.err (!%p134_p1)
}
 0x19b   :  { %81 = dma.vmem_to_hbm [thread:$0]  %s79_s27, 128, %s201_s3, [#allocation5]  }
 0x19c   :  { %140 = dma.done.wait [#allocation5], 128  }
 0x19d   :  { %141 = vsyncadd [#allocation5], 4294967168 }
 0x19e   :  { %85 = vsyncpa [#allocation4], 1 }
 0x19f   :  { %86 = vsyncpa [#allocation5], 1 }

</bundles_post_ra>
